<compile_context>
chip_gen: v5e
topology: v5e:2x2
jax: 0.10.0
libtpu: 0.0.40
codegen_flags: <defaults>
</compile_context>

<pallas_src>
import functools
import math

import jax
import jax.numpy as jnp
from jax import lax
from jax.experimental import pallas as pl
from jax.experimental.pallas import tpu as pltpu

_VMEM_LIMIT = 32 * 1024 * 1024
_NEG_INF = -1e30


def _pick_tile(n, candidates):
    """Largest candidate tile that divides n (keeps blocks 8-aligned); else n (full dim)."""
    for c in candidates:
        if n >= c and n % c == 0:
            return c
    return n


# ---------------------------------------------------------------------------
# Fused / tiled linear projection kernel
# ---------------------------------------------------------------------------

def _make_proj_kernel(n_out, d_out):
    def kernel(x_ref, w_ref, b_ref, *o_refs):
        # x: (TM, Din), w: (Din, n_out*Dout), b: (1, n_out*Dout)
        acc = jnp.dot(x_ref[...], w_ref[...], preferred_element_type=jnp.float32)
        acc = acc + b_ref[...]
        for c in range(n_out):
            o_refs[c][...] = acc[:, c * d_out:(c + 1) * d_out].astype(o_refs[c].dtype)
    return kernel


def pallas_fused_linear(x, w, b, n_out):
    """x:(N,Din) @ w:(Din, n_out*Dout) + b -> tuple of n_out arrays (N, Dout)."""
    n, d_in = x.shape
    d_tot = w.shape[1]
    d_out = d_tot // n_out
    tm = _pick_tile(n, (512, 256, 128, 64, 32, 16, 8))
    return pl.pallas_call(
        _make_proj_kernel(n_out, d_out),
        grid=(n // tm,),
        out_shape=tuple(jax.ShapeDtypeStruct((n, d_out), x.dtype) for _ in range(n_out)),
        in_specs=[
            pl.BlockSpec((tm, d_in), lambda i: (i, 0)),
            pl.BlockSpec((d_in, d_tot), lambda i: (0, 0)),   # weight: resident across grid
            pl.BlockSpec((1, d_tot), lambda i: (0, 0)),      # bias: resident across grid
        ],
        out_specs=tuple(pl.BlockSpec((tm, d_out), lambda i: (i, 0)) for _ in range(n_out)),
        compiler_params=pltpu.CompilerParams(
            dimension_semantics=("parallel",),
            vmem_limit_bytes=_VMEM_LIMIT,
        ),
    )(x, w, b)


# ---------------------------------------------------------------------------
# Attention kernel: one (batch, q-tile) step, all heads grouped
# ---------------------------------------------------------------------------

def _make_attn_kernel(num_heads, head_dim, has_attn_mask, has_kpm, mxu_dtype):
    def kernel(*refs):
        i = 0
        q_ref = refs[i]; i += 1
        k_ref = refs[i]; i += 1
        v_ref = refs[i]; i += 1
        am_ref = refs[i] if has_attn_mask else None
        i += int(has_attn_mask)
        kpm_ref = refs[i] if has_kpm else None
        i += int(has_kpm)
        o_ref = refs[i]
        logits_ref = refs[i + 1]

        # Cast once per tile; scale (1/sqrt(Dh)) is already folded into W_q.
        q = q_ref[0].astype(mxu_dtype)     # (TQ, E)
        k = k_ref[0].astype(mxu_dtype)     # (S,  E)
        v = v_ref[0].astype(mxu_dtype)     # (S,  E)

        mask = None                         # additive f32 mask, computed once per step
        if has_attn_mask:
            mask = am_ref[...].astype(jnp.float32)           # (TQ, S)
        if has_kpm:
            kpm = kpm_ref[0].astype(jnp.float32)             # (1, S) -> broadcasts
            mask = kpm if mask is None else mask + kpm

        dim_nums = (((1,), (1,)), ((), ()))                  # contract head_dim of q and k
        ctx_parts = []
        for h in range(num_heads):
            lo = h * head_dim
            hi = lo + head_dim
            qh = q[:, lo:hi]
            kh = k[:, lo:hi]
            vh = v[:, lo:hi]

            # scores with f32 accumulation on the MXU
            s = lax.dot_general(qh, kh, dim_nums,
                                preferred_element_type=jnp.float32)      # (TQ, S)
            if mask is not None:
                s = s + mask
            logits_ref[0, h] = s.astype(logits_ref.dtype)

            # softmax in f32; divide replaced by EUP approx reciprocal
            s_max = jnp.max(s, axis=-1, keepdims=True)
            p = jnp.exp(s - s_max)
            denom = jnp.sum(p, axis=-1, keepdims=True)
            # TODO(synk): fully-masked rows give denom==0 -> inf/NaN (same pathology as torch MHA)
            ctx = jnp.dot(p.astype(mxu_dtype), vh,
                          preferred_element_type=jnp.float32)            # (TQ, Dh)
            ctx_parts.append(ctx * pl.reciprocal(denom, approx=True))

        # lane-dense (TQ, E) context store
        o_ref[0] = jnp.concatenate(ctx_parts, axis=-1).astype(o_ref.dtype)
    return kernel


def pallas_attention(q, k, v, *, num_heads, attn_mask=None, kpm_add=None,
                     logits_dtype=jnp.float32, mxu_dtype=jnp.bfloat16):
    """q:(B,L,E), k/v:(B,S,E) -> context (B,L,E) f32, logits (B,H,L,S)."""
    b, l, e = q.shape
    s = k.shape[1]
    h = num_heads
    assert e % h == 0, "embed_dim must be divisible by num_heads"
    dh = e // h
    tq = _pick_tile(l, (256, 128, 64, 32, 16, 8))

    in_specs = [
        pl.BlockSpec((1, tq, e), lambda bi, ti: (bi, ti, 0)),   # q tile
        pl.BlockSpec((1, s, e), lambda bi, ti: (bi, 0, 0)),     # full K (revisited across ti)
        pl.BlockSpec((1, s, e), lambda bi, ti: (bi, 0, 0)),     # full V (revisited across ti)
    ]
    operands = [q, k, v]
    if attn_mask is not None:                                    # (L, S) additive, broadcast over B
        in_specs.append(pl.BlockSpec((tq, s), lambda bi, ti: (ti, 0)))
        operands.append(attn_mask)
    if kpm_add is not None:                                      # (B, 1, S) additive
        in_specs.append(pl.BlockSpec((1, 1, s), lambda bi, ti: (bi, 0, 0)))
        operands.append(kpm_add)

    kernel = _make_attn_kernel(h, dh, attn_mask is not None, kpm_add is not None, mxu_dtype)
    out, logits = pl.pallas_call(
        kernel,
        grid=(b, l // tq),
        out_shape=(
            jax.ShapeDtypeStruct((b, l, e), jnp.float32),
            jax.ShapeDtypeStruct((b, h, l, s), logits_dtype),
        ),
        in_specs=in_specs,
        out_specs=(
            pl.BlockSpec((1, tq, e), lambda bi, ti: (bi, ti, 0)),
            pl.BlockSpec((1, h, tq, s), lambda bi, ti: (bi, 0, ti, 0)),
        ),
        compiler_params=pltpu.CompilerParams(
            dimension_semantics=("parallel", "parallel"),
            vmem_limit_bytes=_VMEM_LIMIT,
        ),
    )(*operands)
    return out, logits


# ---------------------------------------------------------------------------
# KSBaseMultiheadAttention forward (glue in plain JAX, hot paths in Pallas)
# ---------------------------------------------------------------------------

def init_params(key, embed_dim):
    k1, k2 = jax.random.split(key)
    bound = 1.0 / math.sqrt(embed_dim)
    return {
        # packed q/k/v projection, as in torch.nn.MultiheadAttention
        "in_proj_weight": jax.random.uniform(
            k1, (3 * embed_dim, embed_dim), jnp.float32, -bound, bound),
        "in_proj_bias": jnp.zeros((3 * embed_dim,), jnp.float32),
        "out_proj_weight": jax.random.uniform(
            k2, (embed_dim, embed_dim), jnp.float32, -bound, bound),
        "out_proj_bias": jnp.zeros((embed_dim,), jnp.float32),
    }


def ks_base_multihead_attention(
    params, query, key=None, value=None, identity=None,
    query_pos=None, key_pos=None, attn_mask=None, key_padding_mask=None,
    *, num_heads, batch_first=False,
    logits_dtype=jnp.float32, mxu_dtype=jnp.bfloat16,
):
    if key is None:
        key = query
    if value is None:
        value = key
    if identity is None:
        identity = query
    if key_pos is None and query_pos is not None and query_pos.shape == key.shape:
        key_pos = query_pos

    # Build projection inputs, reusing the SAME python object when the projected
    # tensors are identical so that q/k/v projections sharing an input fuse into
    # a single matmul (e.g. self-attention -> one (E, 2E) and one (E, E) matmul,
    # or a single (E, 3E) matmul when there is no positional embedding).
    q_in = query if query_pos is None else query + query_pos
    if (key is query) and (key_pos is query_pos):
        k_in = q_in
    else:
        k_in = key if key_pos is None else key + key_pos
    v_in = value

    if batch_first:
        B, L, E = query.shape
        S = key.shape[1]
    else:
        L, B, E = query.shape
        S = key.shape[0]
    H = num_heads
    Dh = E // H
    scale = 1.0 / math.sqrt(Dh)

    # torch Linear convention y = x @ W^T + b; fold 1/sqrt(Dh) into the q projection.
    w_in = params["in_proj_weight"]
    b_in = params["in_proj_bias"]
    role_w = {"q": (w_in[:E] * scale).T, "k": w_in[E:2 * E].T, "v": w_in[2 * E:].T}
    role_b = {"q": b_in[:E] * scale, "k": b_in[E:2 * E], "v": b_in[2 * E:]}

    # Group projection roles by identical input tensor -> one fused matmul per group.
    groups = []
    for role, x in (("q", q_in), ("k", k_in), ("v", v_in)):
        for g in groups:
            if g[0] is x:
                g[1].append(role)
                break
        else:
            groups.append([x, [role]])

    proj = {}
    for x, roles in groups:
        xb = x if batch_first else jnp.swapaxes(x, 0, 1)      # (B, N, E) batch-major
        nb = xb.shape[1]
        w_cat = jnp.concatenate([role_w[r] for r in roles], axis=1)   # (E, C*E)
        b_cat = jnp.concatenate([role_b[r] for r in roles], axis=0)[None, :]
        outs = pallas_fused_linear(xb.reshape(B * nb, E), w_cat, b_cat, len(roles))
        for r, o in zip(roles, outs):
            proj[r] = o.reshape(B, nb, E)

    q_p, k_p, v_p = proj["q"], proj["k"], proj["v"]

    # masks -> additive float form (no dense (B*H,L,S) mask is ever materialized)
    am_add = None
    if attn_mask is not None:
        if attn_mask.dtype == jnp.bool_:
            am_add = jnp.where(attn_mask, jnp.float32(_NEG_INF), jnp.float32(0.0))
        else:
            am_add = attn_mask.astype(jnp.float32)
    kpm_add = None
    if key_padding_mask is not None:
        kpm_add = jnp.where(key_padding_mask, jnp.float32(_NEG_INF),
                            jnp.float32(0.0))[:, None, :]             # (B, 1, S)

    ctx, logits = pallas_attention(
        q_p, k_p, v_p, num_heads=H, attn_mask=am_add, kpm_add=kpm_add,
        logits_dtype=logits_dtype, mxu_dtype=mxu_dtype)

    # out projection on the lane-dense (B*L, E) context
    out = pallas_fused_linear(ctx.reshape(B * L, E),
                              params["out_proj_weight"].T,
                              params["out_proj_bias"][None, :], 1)[0]
    out = out.reshape(B, L, E)
    if not batch_first:
        out = jnp.swapaxes(out, 0, 1)

    # proj_drop = 0.0 -> identity; residual addition
    output = [identity + out.astype(identity.dtype)]
    self_attn_out_dict = {"attn_map_logits": logits}
    return output, self_attn_out_dict


# ---------------------------------------------------------------------------
# Example
# ---------------------------------------------------------------------------

if __name__ == "__main__":
    EMBED_DIM = 32
    NUM_HEADS = 4
    NUM_QUERY = 8
    BATCH = 2

    root = jax.random.PRNGKey(0)
    k_params, k_q, k_pos = jax.random.split(root, 3)

    params = init_params(k_params, EMBED_DIM)

    # batch_first=False layout: (num_query, bs, embed_dim)
    query = jax.random.normal(k_q, (NUM_QUERY, BATCH, EMBED_DIM), jnp.float32)
    query_pos = jax.random.normal(k_pos, (NUM_QUERY, BATCH, EMBED_DIM), jnp.float32)

    fwd = jax.jit(functools.partial(
        ks_base_multihead_attention, num_heads=NUM_HEADS, batch_first=False))

    # maskless path (common DETR decoder self-attn case -> no mask DMA at all)
    output, attn_dict = fwd(params, query, query_pos=query_pos)
    out = jax.block_until_ready(output[0])
    logits = jax.block_until_ready(attn_dict["attn_map_logits"])
    assert out.shape == (NUM_QUERY, BATCH, EMBED_DIM)
    assert logits.shape == (BATCH, NUM_HEADS, NUM_QUERY, NUM_QUERY)
    assert jnp.all(jnp.isfinite(out)) and jnp.all(jnp.isfinite(logits))

    # masked-path smoke test (attn_mask + key_padding_mask kernel variant)
    causal = jnp.triu(jnp.ones((NUM_QUERY, NUM_QUERY), bool), k=1)
    kpm = jnp.zeros((BATCH, NUM_QUERY), bool).at[1, -1].set(True)
    output_m, attn_dict_m = fwd(params, query, query_pos=query_pos,
                                attn_mask=causal, key_padding_mask=kpm)
    out_m = jax.block_until_ready(output_m[0])
    logits_m = jax.block_until_ready(attn_dict_m["attn_map_logits"])
    assert out_m.shape == out.shape and logits_m.shape == logits.shape
    assert jnp.all(jnp.isfinite(out_m))

    print("KERNEL_OK")
</pallas_src>

<mosaic_0001>
module attributes {stable_mosaic.version = 11 : i64} {
  func.func @kernel(%arg0: i32, %arg1: memref<16x32xf32, #tpu.memory_space<vmem>>, %arg2: memref<32x64xf32, #tpu.memory_space<vmem>>, %arg3: memref<1x64xf32, #tpu.memory_space<vmem>>, %arg4: memref<16x32xf32, #tpu.memory_space<vmem>>, %arg5: memref<16x32xf32, #tpu.memory_space<vmem>>) attributes {dimension_semantics = [#tpu.dimension_semantics<parallel>], iteration_bounds = array<i64: 1>, scalar_prefetch = 0 : i64, scratch_operands = 0 : i64, tpu.core_type = #tpu.core_type<tc>, window_params = [{transform_indices = @transform_0, window_bounds = array<i64: 16, 32>}, {pipeline_mode = #tpu.pipeline_mode<synchronous>, transform_indices = @transform_1, window_bounds = array<i64: 32, 64>}, {pipeline_mode = #tpu.pipeline_mode<synchronous>, transform_indices = @transform_2, window_bounds = array<i64: 1, 64>}, {transform_indices = @transform_3, window_bounds = array<i64: 16, 32>}, {transform_indices = @transform_4, window_bounds = array<i64: 16, 32>}]} {
    %c0 = arith.constant 0 : index
    %c0_0 = arith.constant 0 : index
    %0 = vector.load %arg1[%c0, %c0_0] : memref<16x32xf32, #tpu.memory_space<vmem>>, vector<16x32xf32>
    %c0_1 = arith.constant 0 : index
    %c0_2 = arith.constant 0 : index
    %1 = vector.load %arg2[%c0_1, %c0_2] : memref<32x64xf32, #tpu.memory_space<vmem>>, vector<32x64xf32>
    %cst = arith.constant dense<0.000000e+00> : vector<16x64xf32>
    %2 = tpu.matmul %0, %1, %cst {dimension_numbers = #tpu.dot_dimension_numbers<[1], [0], [0], [1], [0, 0, 1, 1], [], []>} : vector<16x32xf32>, vector<32x64xf32>, vector<16x64xf32> -> vector<16x64xf32>
    %c0_3 = arith.constant 0 : index
    %c0_4 = arith.constant 0 : index
    %3 = vector.load %arg3[%c0_3, %c0_4] : memref<1x64xf32, #tpu.memory_space<vmem>>, vector<1x64xf32>
    %4 = vector.broadcast %3 : vector<1x64xf32> to vector<16x64xf32>
    %5 = arith.addf %2, %4 : vector<16x64xf32>
    %6 = vector.extract_strided_slice %5 {offsets = [0, 0], sizes = [16, 32], strides = [1, 1]} : vector<16x64xf32> to vector<16x32xf32>
    %c0_5 = arith.constant 0 : index
    %c0_6 = arith.constant 0 : index
    %7 = vector.load %arg4[%c0_5, %c0_6] : memref<16x32xf32, #tpu.memory_space<vmem>>, vector<16x32xf32>
    tpu.vector_store %arg4[%c0_5, %c0_6], %6 {strides = array<i32>} : memref<16x32xf32, #tpu.memory_space<vmem>>, vector<16x32xf32>,
    %8 = vector.extract_strided_slice %5 {offsets = [0, 32], sizes = [16, 32], strides = [1, 1]} : vector<16x64xf32> to vector<16x32xf32>
    %c0_7 = arith.constant 0 : index
    %c0_8 = arith.constant 0 : index
    %9 = vector.load %arg5[%c0_7, %c0_8] : memref<16x32xf32, #tpu.memory_space<vmem>>, vector<16x32xf32>
    tpu.vector_store %arg5[%c0_7, %c0_8], %8 {strides = array<i32>} : memref<16x32xf32, #tpu.memory_space<vmem>>, vector<16x32xf32>,
    return
  }
  func.func @transform_0(%arg0: i32) -> (i32, i32) {
    %c0_i32 = arith.constant 0 : i32
    %c0_i32_0 = arith.constant 0 : i32
    return %arg0, %c0_i32 : i32, i32
  }
  func.func @transform_1(%arg0: i32) -> (i32, i32) {
    %c0_i32 = arith.constant 0 : i32
    %c0_i32_0 = arith.constant 0 : i32
    %c0_i32_1 = arith.constant 0 : i32
    return %c0_i32, %c0_i32_0 : i32, i32
  }
  func.func @transform_2(%arg0: i32) -> (i32, i32) {
    %c0_i32 = arith.constant 0 : i32
    %c0_i32_0 = arith.constant 0 : i32
    %c0_i32_1 = arith.constant 0 : i32
    return %c0_i32, %c0_i32_0 : i32, i32
  }
  func.func @transform_3(%arg0: i32) -> (i32, i32) {
    %c0_i32 = arith.constant 0 : i32
    %c0_i32_0 = arith.constant 0 : i32
    return %arg0, %c0_i32 : i32, i32
  }
  func.func @transform_4(%arg0: i32) -> (i32, i32) {
    %c0_i32 = arith.constant 0 : i32
    %c0_i32_0 = arith.constant 0 : i32
    return %arg0, %c0_i32 : i32, i32
  }
}

module attributes {stable_mosaic.version = 11 : i64} {
  func.func @kernel(%arg0: i32, %arg1: memref<16x32xf32, #tpu.memory_space<vmem>>, %arg2: memref<32x32xf32, #tpu.memory_space<vmem>>, %arg3: memref<1x32xf32, #tpu.memory_space<vmem>>, %arg4: memref<16x32xf32, #tpu.memory_space<vmem>>) attributes {dimension_semantics = [#tpu.dimension_semantics<parallel>], iteration_bounds = array<i64: 1>, scalar_prefetch = 0 : i64, scratch_operands = 0 : i64, tpu.core_type = #tpu.core_type<tc>, window_params = [{transform_indices = @transform_0, window_bounds = array<i64: 16, 32>}, {pipeline_mode = #tpu.pipeline_mode<synchronous>, transform_indices = @transform_1, window_bounds = array<i64: 32, 32>}, {pipeline_mode = #tpu.pipeline_mode<synchronous>, transform_indices = @transform_2, window_bounds = array<i64: 1, 32>}, {transform_indices = @transform_3, window_bounds = array<i64: 16, 32>}]} {
    %c0 = arith.constant 0 : index
    %c0_0 = arith.constant 0 : index
    %0 = vector.load %arg1[%c0, %c0_0] : memref<16x32xf32, #tpu.memory_space<vmem>>, vector<16x32xf32>
    %c0_1 = arith.constant 0 : index
    %c0_2 = arith.constant 0 : index
    %1 = vector.load %arg2[%c0_1, %c0_2] : memref<32x32xf32, #tpu.memory_space<vmem>>, vector<32x32xf32>
    %cst = arith.constant dense<0.000000e+00> : vector<16x32xf32>
    %2 = tpu.matmul %0, %1, %cst {dimension_numbers = #tpu.dot_dimension_numbers<[1], [0], [0], [1], [0, 0, 1, 1], [], []>} : vector<16x32xf32>, vector<32x32xf32>, vector<16x32xf32> -> vector<16x32xf32>
    %c0_3 = arith.constant 0 : index
    %c0_4 = arith.constant 0 : index
    %3 = vector.load %arg3[%c0_3, %c0_4] : memref<1x32xf32, #tpu.memory_space<vmem>>, vector<1x32xf32>
    %4 = vector.broadcast %3 : vector<1x32xf32> to vector<16x32xf32>
    %5 = arith.addf %2, %4 : vector<16x32xf32>
    %c0_5 = arith.constant 0 : index
    %c0_6 = arith.constant 0 : index
    %6 = vector.load %arg4[%c0_5, %c0_6] : memref<16x32xf32, #tpu.memory_space<vmem>>, vector<16x32xf32>
    tpu.vector_store %arg4[%c0_5, %c0_6], %5 {strides = array<i32>} : memref<16x32xf32, #tpu.memory_space<vmem>>, vector<16x32xf32>,
    return
  }
  func.func @transform_0(%arg0: i32) -> (i32, i32) {
    %c0_i32 = arith.constant 0 : i32
    %c0_i32_0 = arith.constant 0 : i32
    return %arg0, %c0_i32 : i32, i32
  }
  func.func @transform_1(%arg0: i32) -> (i32, i32) {
    %c0_i32 = arith.constant 0 : i32
    %c0_i32_0 = arith.constant 0 : i32
    %c0_i32_1 = arith.constant 0 : i32
    return %c0_i32, %c0_i32_0 : i32, i32
  }
  func.func @transform_2(%arg0: i32) -> (i32, i32) {
    %c0_i32 = arith.constant 0 : i32
    %c0_i32_0 = arith.constant 0 : i32
    %c0_i32_1 = arith.constant 0 : i32
    return %c0_i32, %c0_i32_0 : i32, i32
  }
  func.func @transform_3(%arg0: i32) -> (i32, i32) {
    %c0_i32 = arith.constant 0 : i32
    %c0_i32_0 = arith.constant 0 : i32
    return %arg0, %c0_i32 : i32, i32
  }
}

module attributes {stable_mosaic.version = 11 : i64} {
  func.func @kernel(%arg0: i32, %arg1: i32, %arg2: memref<1x8x32xf32, #tpu.memory_space<vmem>>, %arg3: memref<1x8x32xf32, #tpu.memory_space<vmem>>, %arg4: memref<1x8x32xf32, #tpu.memory_space<vmem>>, %arg5: memref<1x8x32xf32, #tpu.memory_space<vmem>>, %arg6: memref<1x4x8x8xf32, #tpu.memory_space<vmem>>) attributes {dimension_semantics = [#tpu.dimension_semantics<parallel>, #tpu.dimension_semantics<parallel>], iteration_bounds = array<i64: 2, 1>, scalar_prefetch = 0 : i64, scratch_operands = 0 : i64, tpu.core_type = #tpu.core_type<tc>, window_params = [{transform_indices = @transform_0, window_bounds = array<i64: 1, 8, 32>}, {transform_indices = @transform_1, window_bounds = array<i64: 1, 8, 32>}, {transform_indices = @transform_2, window_bounds = array<i64: 1, 8, 32>}, {transform_indices = @transform_3, window_bounds = array<i64: 1, 8, 32>}, {transform_indices = @transform_4, window_bounds = array<i64: 1, 4, 8, 8>}]} {
    %c0 = arith.constant 0 : index
    %c0_0 = arith.constant 0 : index
    %c0_1 = arith.constant 0 : index
    %0 = vector.load %arg2[%c0, %c0_0, %c0_1] : memref<1x8x32xf32, #tpu.memory_space<vmem>>, vector<1x8x32xf32>
    %1 = vector.shape_cast %0 : vector<1x8x32xf32> to vector<8x32xf32>
    %2 = arith.truncf %1 : vector<8x32xf32> to vector<8x32xbf16>
    %c0_2 = arith.constant 0 : index
    %c0_3 = arith.constant 0 : index
    %c0_4 = arith.constant 0 : index
    %3 = vector.load %arg3[%c0_2, %c0_3, %c0_4] : memref<1x8x32xf32, #tpu.memory_space<vmem>>, vector<1x8x32xf32>
    %4 = vector.shape_cast %3 : vector<1x8x32xf32> to vector<8x32xf32>
    %5 = arith.truncf %4 : vector<8x32xf32> to vector<8x32xbf16>
    %c0_5 = arith.constant 0 : index
    %c0_6 = arith.constant 0 : index
    %c0_7 = arith.constant 0 : index
    %6 = vector.load %arg4[%c0_5, %c0_6, %c0_7] : memref<1x8x32xf32, #tpu.memory_space<vmem>>, vector<1x8x32xf32>
    %7 = vector.shape_cast %6 : vector<1x8x32xf32> to vector<8x32xf32>
    %8 = arith.truncf %7 : vector<8x32xf32> to vector<8x32xbf16>
    %9 = vector.extract_strided_slice %2 {offsets = [0, 0], sizes = [8, 8], strides = [1, 1]} : vector<8x32xbf16> to vector<8x8xbf16>
    %10 = vector.extract_strided_slice %5 {offsets = [0, 0], sizes = [8, 8], strides = [1, 1]} : vector<8x32xbf16> to vector<8x8xbf16>
    %11 = vector.extract_strided_slice %8 {offsets = [0, 0], sizes = [8, 8], strides = [1, 1]} : vector<8x32xbf16> to vector<8x8xbf16>
    %cst = arith.constant dense<0.000000e+00> : vector<8x8xf32>
    %12 = tpu.matmul %9, %10, %cst {dimension_numbers = #tpu.dot_dimension_numbers<[1], [1], [0], [0], [0, 0, 1, 0], [], []>} : vector<8x8xbf16>, vector<8x8xbf16>, vector<8x8xf32> -> vector<8x8xf32>
    %c0_8 = arith.constant 0 : index
    %c0_9 = arith.constant 0 : index
    %c0_10 = arith.constant 0 : index
    %c0_11 = arith.constant 0 : index
    %13 = vector.load %arg6[%c0_8, %c0_9, %c0_10, %c0_11] : memref<1x4x8x8xf32, #tpu.memory_space<vmem>>, vector<1x1x8x8xf32>
    %14 = vector.shape_cast %13 : vector<1x1x8x8xf32> to vector<8x8xf32>
    %15 = vector.shape_cast %12 : vector<8x8xf32> to vector<1x1x8x8xf32>
    tpu.vector_store %arg6[%c0_8, %c0_9, %c0_10, %c0_11], %15 {strides = array<i32>} : memref<1x4x8x8xf32, #tpu.memory_space<vmem>>, vector<1x1x8x8xf32>,
    %cst_12 = arith.constant dense<0xFF800000> : vector<8xf32>
    %16 = vector.multi_reduction <maximumf>, %12, %cst_12 [1] : vector<8x8xf32> to vector<8xf32>
    %17 = vector.shape_cast %16 : vector<8xf32> to vector<8x1xf32>
    %18 = vector.broadcast %17 : vector<8x1xf32> to vector<8x8xf32>
    %19 = arith.subf %12, %18 : vector<8x8xf32>
    %20 = math.exp %19 : vector<8x8xf32>
    %cst_13 = arith.constant dense<0.000000e+00> : vector<8xf32>
    %21 = vector.multi_reduction <add>, %20, %cst_13 [1] : vector<8x8xf32> to vector<8xf32>
    %22 = vector.shape_cast %21 : vector<8xf32> to vector<8x1xf32>
    %23 = arith.truncf %20 : vector<8x8xf32> to vector<8x8xbf16>
    %cst_14 = arith.constant dense<0.000000e+00> : vector<8x8xf32>
    %24 = tpu.matmul %23, %11, %cst_14 {dimension_numbers = #tpu.dot_dimension_numbers<[1], [0], [0], [1], [0, 0, 1, 1], [], []>} : vector<8x8xbf16>, vector<8x8xbf16>, vector<8x8xf32> -> vector<8x8xf32>
    %25 = tpu.reciprocal %22 {approx = true} : vector<8x1xf32> -> vector<8x1xf32>
    %26 = vector.broadcast %25 : vector<8x1xf32> to vector<8x8xf32>
    %27 = arith.mulf %24, %26 : vector<8x8xf32>
    %28 = vector.extract_strided_slice %2 {offsets = [0, 8], sizes = [8, 8], strides = [1, 1]} : vector<8x32xbf16> to vector<8x8xbf16>
    %29 = vector.extract_strided_slice %5 {offsets = [0, 8], sizes = [8, 8], strides = [1, 1]} : vector<8x32xbf16> to vector<8x8xbf16>
    %30 = vector.extract_strided_slice %8 {offsets = [0, 8], sizes = [8, 8], strides = [1, 1]} : vector<8x32xbf16> to vector<8x8xbf16>
    %cst_15 = arith.constant dense<0.000000e+00> : vector<8x8xf32>
    %31 = tpu.matmul %28, %29, %cst_15 {dimension_numbers = #tpu.dot_dimension_numbers<[1], [1], [0], [0], [0, 0, 1, 0], [], []>} : vector<8x8xbf16>, vector<8x8xbf16>, vector<8x8xf32> -> vector<8x8xf32>
    %c0_16 = arith.constant 0 : index
    %c1 = arith.constant 1 : index
    %c0_17 = arith.constant 0 : index
    %c0_18 = arith.constant 0 : index
    %32 = vector.load %arg6[%c0_16, %c1, %c0_17, %c0_18] : memref<1x4x8x8xf32, #tpu.memory_space<vmem>>, vector<1x1x8x8xf32>
    %33 = vector.shape_cast %32 : vector<1x1x8x8xf32> to vector<8x8xf32>
    %34 = vector.shape_cast %31 : vector<8x8xf32> to vector<1x1x8x8xf32>
    tpu.vector_store %arg6[%c0_16, %c1, %c0_17, %c0_18], %34 {strides = array<i32>} : memref<1x4x8x8xf32, #tpu.memory_space<vmem>>, vector<1x1x8x8xf32>,
    %cst_19 = arith.constant dense<0xFF800000> : vector<8xf32>
    %35 = vector.multi_reduction <maximumf>, %31, %cst_19 [1] : vector<8x8xf32> to vector<8xf32>
    %36 = vector.shape_cast %35 : vector<8xf32> to vector<8x1xf32>
    %37 = vector.broadcast %36 : vector<8x1xf32> to vector<8x8xf32>
    %38 = arith.subf %31, %37 : vector<8x8xf32>
    %39 = math.exp %38 : vector<8x8xf32>
    %cst_20 = arith.constant dense<0.000000e+00> : vector<8xf32>
    %40 = vector.multi_reduction <add>, %39, %cst_20 [1] : vector<8x8xf32> to vector<8xf32>
    %41 = vector.shape_cast %40 : vector<8xf32> to vector<8x1xf32>
    %42 = arith.truncf %39 : vector<8x8xf32> to vector<8x8xbf16>
    %cst_21 = arith.constant dense<0.000000e+00> : vector<8x8xf32>
    %43 = tpu.matmul %42, %30, %cst_21 {dimension_numbers = #tpu.dot_dimension_numbers<[1], [0], [0], [1], [0, 0, 1, 1], [], []>} : vector<8x8xbf16>, vector<8x8xbf16>, vector<8x8xf32> -> vector<8x8xf32>
    %44 = tpu.reciprocal %41 {approx = true} : vector<8x1xf32> -> vector<8x1xf32>
    %45 = vector.broadcast %44 : vector<8x1xf32> to vector<8x8xf32>
    %46 = arith.mulf %43, %45 : vector<8x8xf32>
    %47 = vector.extract_strided_slice %2 {offsets = [0, 16], sizes = [8, 8], strides = [1, 1]} : vector<8x32xbf16> to vector<8x8xbf16>
    %48 = vector.extract_strided_slice %5 {offsets = [0, 16], sizes = [8, 8], strides = [1, 1]} : vector<8x32xbf16> to vector<8x8xbf16>
    %49 = vector.extract_strided_slice %8 {offsets = [0, 16], sizes = [8, 8], strides = [1, 1]} : vector<8x32xbf16> to vector<8x8xbf16>
    %cst_22 = arith.constant dense<0.000000e+00> : vector<8x8xf32>
    %50 = tpu.matmul %47, %48, %cst_22 {dimension_numbers = #tpu.dot_dimension_numbers<[1], [1], [0], [0], [0, 0, 1, 0], [], []>} : vector<8x8xbf16>, vector<8x8xbf16>, vector<8x8xf32> -> vector<8x8xf32>
    %c0_23 = arith.constant 0 : index
    %c2 = arith.constant 2 : index
    %c0_24 = arith.constant 0 : index
    %c0_25 = arith.constant 0 : index
    %51 = vector.load %arg6[%c0_23, %c2, %c0_24, %c0_25] : memref<1x4x8x8xf32, #tpu.memory_space<vmem>>, vector<1x1x8x8xf32>
    %52 = vector.shape_cast %51 : vector<1x1x8x8xf32> to vector<8x8xf32>
    %53 = vector.shape_cast %50 : vector<8x8xf32> to vector<1x1x8x8xf32>
    tpu.vector_store %arg6[%c0_23, %c2, %c0_24, %c0_25], %53 {strides = array<i32>} : memref<1x4x8x8xf32, #tpu.memory_space<vmem>>, vector<1x1x8x8xf32>,
    %cst_26 = arith.constant dense<0xFF800000> : vector<8xf32>
    %54 = vector.multi_reduction <maximumf>, %50, %cst_26 [1] : vector<8x8xf32> to vector<8xf32>
    %55 = vector.shape_cast %54 : vector<8xf32> to vector<8x1xf32>
    %56 = vector.broadcast %55 : vector<8x1xf32> to vector<8x8xf32>
    %57 = arith.subf %50, %56 : vector<8x8xf32>
    %58 = math.exp %57 : vector<8x8xf32>
    %cst_27 = arith.constant dense<0.000000e+00> : vector<8xf32>
    %59 = vector.multi_reduction <add>, %58, %cst_27 [1] : vector<8x8xf32> to vector<8xf32>
    %60 = vector.shape_cast %59 : vector<8xf32> to vector<8x1xf32>
    %61 = arith.truncf %58 : vector<8x8xf32> to vector<8x8xbf16>
    %cst_28 = arith.constant dense<0.000000e+00> : vector<8x8xf32>
    %62 = tpu.matmul %61, %49, %cst_28 {dimension_numbers = #tpu.dot_dimension_numbers<[1], [0], [0], [1], [0, 0, 1, 1], [], []>} : vector<8x8xbf16>, vector<8x8xbf16>, vector<8x8xf32> -> vector<8x8xf32>
    %63 = tpu.reciprocal %60 {approx = true} : vector<8x1xf32> -> vector<8x1xf32>
    %64 = vector.broadcast %63 : vector<8x1xf32> to vector<8x8xf32>
    %65 = arith.mulf %62, %64 : vector<8x8xf32>
    %66 = vector.extract_strided_slice %2 {offsets = [0, 24], sizes = [8, 8], strides = [1, 1]} : vector<8x32xbf16> to vector<8x8xbf16>
    %67 = vector.extract_strided_slice %5 {offsets = [0, 24], sizes = [8, 8], strides = [1, 1]} : vector<8x32xbf16> to vector<8x8xbf16>
    %68 = vector.extract_strided_slice %8 {offsets = [0, 24], sizes = [8, 8], strides = [1, 1]} : vector<8x32xbf16> to vector<8x8xbf16>
    %cst_29 = arith.constant dense<0.000000e+00> : vector<8x8xf32>
    %69 = tpu.matmul %66, %67, %cst_29 {dimension_numbers = #tpu.dot_dimension_numbers<[1], [1], [0], [0], [0, 0, 1, 0], [], []>} : vector<8x8xbf16>, vector<8x8xbf16>, vector<8x8xf32> -> vector<8x8xf32>
    %c0_30 = arith.constant 0 : index
    %c3 = arith.constant 3 : index
    %c0_31 = arith.constant 0 : index
    %c0_32 = arith.constant 0 : index
    %70 = vector.load %arg6[%c0_30, %c3, %c0_31, %c0_32] : memref<1x4x8x8xf32, #tpu.memory_space<vmem>>, vector<1x1x8x8xf32>
    %71 = vector.shape_cast %70 : vector<1x1x8x8xf32> to vector<8x8xf32>
    %72 = vector.shape_cast %69 : vector<8x8xf32> to vector<1x1x8x8xf32>
    tpu.vector_store %arg6[%c0_30, %c3, %c0_31, %c0_32], %72 {strides = array<i32>} : memref<1x4x8x8xf32, #tpu.memory_space<vmem>>, vector<1x1x8x8xf32>,
    %cst_33 = arith.constant dense<0xFF800000> : vector<8xf32>
    %73 = vector.multi_reduction <maximumf>, %69, %cst_33 [1] : vector<8x8xf32> to vector<8xf32>
    %74 = vector.shape_cast %73 : vector<8xf32> to vector<8x1xf32>
    %75 = vector.broadcast %74 : vector<8x1xf32> to vector<8x8xf32>
    %76 = arith.subf %69, %75 : vector<8x8xf32>
    %77 = math.exp %76 : vector<8x8xf32>
    %cst_34 = arith.constant dense<0.000000e+00> : vector<8xf32>
    %78 = vector.multi_reduction <add>, %77, %cst_34 [1] : vector<8x8xf32> to vector<8xf32>
    %79 = vector.shape_cast %78 : vector<8xf32> to vector<8x1xf32>
    %80 = arith.truncf %77 : vector<8x8xf32> to vector<8x8xbf16>
    %cst_35 = arith.constant dense<0.000000e+00> : vector<8x8xf32>
    %81 = tpu.matmul %80, %68, %cst_35 {dimension_numbers = #tpu.dot_dimension_numbers<[1], [0], [0], [1], [0, 0, 1, 1], [], []>} : vector<8x8xbf16>, vector<8x8xbf16>, vector<8x8xf32> -> vector<8x8xf32>
    %82 = tpu.reciprocal %79 {approx = true} : vector<8x1xf32> -> vector<8x1xf32>
    %83 = vector.broadcast %82 : vector<8x1xf32> to vector<8x8xf32>
    %84 = arith.mulf %81, %83 : vector<8x8xf32>
    %85 = tpu.concatenate %27, %46, %65, %84 in 1 : vector<8x8xf32>, vector<8x8xf32>, vector<8x8xf32>, vector<8x8xf32> -> vector<8x32xf32>
    %c0_36 = arith.constant 0 : index
    %c0_37 = arith.constant 0 : index
    %c0_38 = arith.constant 0 : index
    %86 = vector.load %arg5[%c0_36, %c0_37, %c0_38] : memref<1x8x32xf32, #tpu.memory_space<vmem>>, vector<1x8x32xf32>
    %87 = vector.shape_cast %86 : vector<1x8x32xf32> to vector<8x32xf32>
    %88 = vector.shape_cast %85 : vector<8x32xf32> to vector<1x8x32xf32>
    tpu.vector_store %arg5[%c0_36, %c0_37, %c0_38], %88 {strides = array<i32>} : memref<1x8x32xf32, #tpu.memory_space<vmem>>, vector<1x8x32xf32>,
    return
  }
  func.func @transform_0(%arg0: i32, %arg1: i32) -> (i32, i32, i32) {
    %c0_i32 = arith.constant 0 : i32
    %c0_i32_0 = arith.constant 0 : i32
    return %arg0, %arg1, %c0_i32 : i32, i32, i32
  }
  func.func @transform_1(%arg0: i32, %arg1: i32) -> (i32, i32, i32) {
    %c0_i32 = arith.constant 0 : i32
    %c0_i32_0 = arith.constant 0 : i32
    %c0_i32_1 = arith.constant 0 : i32
    return %arg0, %c0_i32, %c0_i32_0 : i32, i32, i32
  }
  func.func @transform_2(%arg0: i32, %arg1: i32) -> (i32, i32, i32) {
    %c0_i32 = arith.constant 0 : i32
    %c0_i32_0 = arith.constant 0 : i32
    %c0_i32_1 = arith.constant 0 : i32
    return %arg0, %c0_i32, %c0_i32_0 : i32, i32, i32
  }
  func.func @transform_3(%arg0: i32, %arg1: i32) -> (i32, i32, i32) {
    %c0_i32 = arith.constant 0 : i32
    %c0_i32_0 = arith.constant 0 : i32
    return %arg0, %arg1, %c0_i32 : i32, i32, i32
  }
  func.func @transform_4(%arg0: i32, %arg1: i32) -> (i32, i32, i32, i32) {
    %c0_i32 = arith.constant 0 : i32
    %c0_i32_0 = arith.constant 0 : i32
    %c0_i32_1 = arith.constant 0 : i32
    return %arg0, %c0_i32, %arg1, %c0_i32_0 : i32, i32, i32, i32
  }
}

</mosaic_0001>

<bundles_post_ra>
// kernel: ks_base_multihead_attention.4
= control target key start
LH: loop header
LB: loop body
LE: loop exit
PB: predicated region body
PF: predicated region fallthrough
CT: control target
= control target key end

     0   :  { %vm26_vm0 = vcmask 261120   ;;  %s149_s1 = inlined_call_operand.vmem [shape: f32[32,64], index: 1, kind: input, shape index: {}]   ;;  %s150_s2 = inlined_call_operand.vmem [shape: f32[1,64], index: 2, kind: input, shape index: {}]   ;;  %s151_s0 = inlined_call_operand.vmem [shape: f32[16,32], index: 0, kind: input, shape index: {}]   ;;  %s152_s3 = inlined_call_operand.vmem [shape: f32[16,32], index: 3, kind: output, shape index: {0}]   ;;  %s153_s4 = inlined_call_operand.vmem [shape: f32[16,32], index: 4, kind: output, shape index: {1}]  }
   0x1   :  { %v21_v0 = vld [vmem:[%s149_s1 + $0x18] sm:$0xff]  ;;  %v20_v1 = vld [vmem:[%s149_s1 + $0x10] sm:$0xff]  ;;  %v19_v2 = vld [vmem:[%s149_s1 + $0x8] sm:$0xff] }
   0x2   :  { %45 = vmatpush.msra.mxu0 %v21_v0  ;;  %78 = vmatpush.msra.mxu1 %v21_v0  ;;  %v18_v3 = vld [vmem:[%s149_s1] sm:$0xff]  ;;  %v17_v5 = vld [vmem:[%s151_s0 + $0x8] sm:$0xff] }
   0x3   :  { %v16_v4 = vld [vmem:[%s151_s0] sm:$0xff]  ;;  %s84_s0 = smov 96  }
   0x4   :  { %46 = vmatpush.msra.mxu0 %v20_v1  ;;  %79 = vmatpush.msra.mxu1 %v20_v1  ;;  %v83_v6 = vld [vmem:[%s150_s2] ss:$0 sm:$0xff] }
   0x6   :  { %47 = vmatpush.msra.mxu0 %v19_v2  ;;  %80 = vmatpush.msra.mxu1 %v19_v2 }
   0x8   :  { %48 = vmatpush.msra.mxu0 %v18_v3  ;;  %81 = vmatpush.msra.mxu1 %v18_v3 }
   0x9   :  { %76 = vmatmul.msk.f32.vlgmr.msra.gmra.mxu0 %vm26_vm0, %v16_v4  ;;  %77 = vmatmul.msk.f32.vlgmr.msra.gmra.mxu1 %vm26_vm0, %v17_v5 }
  0x86   :  { %v50_v7 = vpop.f32.mrf.mxu0  ;;  %v53_v8 = vpop.f32.mrf.mxu1 }
  0x87   :  { %v51_v9 = vadd.f32 %v83_v6, %v50_v7  ;;  %v54_v10 = vadd.f32 %v83_v6, %v53_v8 }
  0x89   :  { %56 = vst.msk [vmem:[%s152_s3] sm:$0xff] %vm26_vm0, %v51_v9  ;;  %60 = vrot.lane.b32.xlu0 %v51_v9, %s84_s0 }
  0x8a   :  { %57 = vst.msk [vmem:[%s152_s3 + $0x8] sm:$0xff] %vm26_vm0, %v54_v10 }
  0x91   :  { %62 = vrot.lane.b32.xlu0 %v54_v10, %s84_s0 }
  0xfb   :  { %v61_v11 = vpop.permute.xlu0 %60 }
  0xfc   :  { %66 = vst.msk [vmem:[%s153_s4] sm:$0xff] %vm26_vm0, %v61_v11 }
 0x103   :  { %v63_v12 = vpop.permute.xlu0 %62 }
 0x104   :  { %67 = vst.msk [vmem:[%s153_s4 + $0x8] sm:$0xff] %vm26_vm0, %v63_v12 }

// kernel: ks_base_multihead_attention.5
= control target key start
LH: loop header
LB: loop body
LE: loop exit
PB: predicated region body
PF: predicated region fallthrough
CT: control target
= control target key end

     0   :  { %vm24_vm0 = vcmask 261120   ;;  %s114_s1 = inlined_call_operand.vmem [shape: f32[32,32], index: 1, kind: input, shape index: {}]   ;;  %s115_s2 = inlined_call_operand.vmem [shape: f32[1,32], index: 2, kind: input, shape index: {}]   ;;  %s116_s0 = inlined_call_operand.vmem [shape: f32[16,32], index: 0, kind: input, shape index: {}]   ;;  %s117_s3 = inlined_call_operand.vmem [shape: f32[16,32], index: 3, kind: output, shape index: {}]  }
   0x1   :  { %v19_v0 = vld [vmem:[%s114_s1 + $0x18] sm:$0xff]  ;;  %v18_v1 = vld [vmem:[%s114_s1 + $0x10] sm:$0xff]  ;;  %v17_v2 = vld [vmem:[%s114_s1 + $0x8] sm:$0xff] }
   0x2   :  { %43 = vmatpush.msra.mxu0 %v19_v0  ;;  %62 = vmatpush.msra.mxu1 %v19_v0  ;;  %v16_v3 = vld [vmem:[%s114_s1] sm:$0xff]  ;;  %v15_v5 = vld [vmem:[%s116_s0 + $0x8] sm:$0xff] }
   0x3   :  { %v14_v4 = vld [vmem:[%s116_s0] sm:$0xff] }
   0x4   :  { %44 = vmatpush.msra.mxu0 %v18_v1  ;;  %63 = vmatpush.msra.mxu1 %v18_v1  ;;  %v66_v6 = vld [vmem:[%s115_s2] ss:$0 sm:$0xff] }
   0x6   :  { %45 = vmatpush.msra.mxu0 %v17_v2  ;;  %64 = vmatpush.msra.mxu1 %v17_v2 }
   0x8   :  { %46 = vmatpush.msra.mxu0 %v16_v3  ;;  %65 = vmatpush.msra.mxu1 %v16_v3 }
   0x9   :  { %60 = vmatmul.msk.f32.vlgmr.msra.gmra.mxu0 %vm24_vm0, %v14_v4  ;;  %61 = vmatmul.msk.f32.vlgmr.msra.gmra.mxu1 %vm24_vm0, %v15_v5 }
  0x86   :  { %v48_v7 = vpop.f32.mrf.mxu0  ;;  %v51_v8 = vpop.f32.mrf.mxu1 }
  0x87   :  { %v49_v9 = vadd.f32 %v66_v6, %v48_v7  ;;  %v52_v10 = vadd.f32 %v66_v6, %v51_v8 }
  0x89   :  { %54 = vst.msk [vmem:[%s117_s3] sm:$0xff] %vm24_vm0, %v49_v9 }
  0x8a   :  { %55 = vst.msk [vmem:[%s117_s3 + $0x8] sm:$0xff] %vm24_vm0, %v52_v10 }

// kernel: ks_base_multihead_attention.6
= control target key start
LH: loop header
LB: loop body
LE: loop exit
PB: predicated region body
PF: predicated region fallthrough
CT: control target
= control target key end

     0   :  { %10 = vsyncpa [#allocation3], 0  ;;  %s1073_s0 = inlined_call_operand.vmem [shape: f32[2,8,32], index: 0, kind: input, shape index: {}]   ;;  %s1074_s1 = inlined_call_operand.vmem [shape: f32[2,8,32], index: 1, kind: input, shape index: {}]   ;;  %s1075_s2 = inlined_call_operand.vmem [shape: f32[2,8,32], index: 2, kind: input, shape index: {}]   ;;  %s1076_s3 = inlined_call_operand.vmem [shape: f32[2,8,32], index: 3, kind: output, shape index: {0}]   ;;  %s1077_s4 = inlined_call_operand.hbm [shape: f32[2,4,8,8], index: 4, kind: output, shape index: {1}]  }
   0x1   :  { %12 = vsyncpa [#allocation3 + $0x1], 0  ;;  %s907_s15 = smov 0   ;;  %s909_s16 = smov 0  }
   0x2   :  { %s911_s17 = smov 0   ;;  %s913_s18 = smov 0  }
   0x3   :  { %s915_s19 = smov 0   ;;  %s917_s20 = smov 0  }
   0x4 LB: > { %s690_s21 = sadd.s32 4294967295, %s873_s20   ;;  %s691_s22 = sadd.s32 4294967294, %s873_s20   ;;  %s873_s20 = sphi %s917_s20, %s18_s20   ;;  %s869_s19 = sphi %s915_s19, %s1084_s19   ;;  %s865_s18 = sphi %s913_s18, %s1083_s18   ;;  %s861_s17 = sphi %s911_s17, %s1082_s17   ;;  %s857_s16 = sphi %s909_s16, %s1081_s16   ;;  %s853_s15 = sphi %s907_s15, %s1080_s15  }
   0x5   : > { %s30_s23 = sadd.s32 1, %s869_s19  ;;  %s147_s24 = sadd.s32 1, %s861_s17 }
   0x6   : > { %p32_p0 = scmp.ge.s32.totalorder %s30_s23, 2  ;;  %p157_p1 = scmp.ne.s32.totalorder %s861_s17, %s857_s16 }
   0x7   : > { %p158_p2 = scmp.eq.s32.totalorder %s690_s21, 1  ;;  %p163_p3 = scmp.ne.s32.totalorder %s857_s16, %s853_s15 }
   0x8   : > { %s1086_s23 = smov (%p32_p0, %s30_s23), 0  ;;  %p164_p5 = scmp.eq.s32.totalorder %s691_s22, 1 }
   0x9   : > { %p947_p4 = por %p158_p2, %p157_p1  ;;  %s142_s26 = ssub.s32 %s869_s19, %s1086_s23 }
   0xa   : > { %p694_p6 = scmp.ge.s32.totalorder %s873_s20, 1  ;;  %p145_p7 = scmp.eq.s32.totalorder %s142_s26, 0 }
   0xb   : > { %p954_p8 = por %p164_p5, %p163_p3  ;;  %p206_p9 = scmp.lt.s32.totalorder %s873_s20, 3 }
   0xc   : > { %s960_s28 = scalar_select %p145_p7, %s861_s17, %s147_s24  }
   0xd   : > { %p207_p10 = pnand %p694_p6, %p206_p9 }
   0xe   : > { %p249_p11 = scmp.lt.s32.totalorder (!%p207_p10), %s865_s18, 1  ;;  %s875_s11 = smov (!%p207_p10), 120  }
   0xf   : > { %210 = sbr.rel (%p207_p10) target bundleno = 835 (0x343), region = 32  ;;  %s876_s12 = smov (!%p207_p10), 104  }
  0x10   : > { %s877_s13 = smov (!%p207_p10), 112   ;;  %s246_s14 = sand.u32 (!%p207_p10), 1, %s857_s16  }
  0x11   : > { %s695_s21 = sshll.u32 (!%p207_p10), %s246_s14, 5  ;;  %s878_s6 = smov (!%p207_p10), 8  }
  0x12   : > { %s985_s22 = scalar_lea.vmem (!%p207_p10), [#allocation2], %s695_s21  ;;  %s815_s24 = scalar_lea.hbm (!%p207_p10), %s1077_s4, 64 }
  0x13   : > { %s557_s5 = sshll.u32 (!%p207_p10), %s985_s22, 4  ;;  %s558_s5 = int_to_ptr.vmem [resolvable:$true] %s557_s5 }
  0x14   : > { %s250_s29 = scalar_select %p249_p11, %s865_s18, 1  ;;  %vm278_vm0 = vcmask 64512   ;;  %vm312_vm1 = vcmask 1043456  }
  0x16   : > { %s964_s30 = sshll.u32 %s250_s29, 3 }
  0x17   : > { %s259_s7 = scalar_lea.vmem %s1074_s1, %s964_s30  ;;  %s255_s10 = scalar_lea.vmem %s1073_s0, %s964_s30 }
  0x18   : > { %v274_v0 = vld [vmem:[%s259_s7] sm:$0xff]  ;;  %s263_s29 = scalar_lea.vmem %s1075_s2, %s964_s30  ;;  %s716_s7 = sshll.u32 %s865_s18, 5 }
  0x19   : > { %v272_v1 = vld [vmem:[%s255_s10] sm:$0xff]  ;;  %v275_v2 = vpack.c.bf16 %v274_v0, %v274_v0  ;;  %s556_s10 = scalar_lea.hbm %s1077_s4, %s716_s7 }
  0x1a   : > { %v273_v3 = vpack.c.bf16 %v272_v1, %v272_v1  ;;  %v276_v17 = vld [vmem:[%s263_s29] sm:$0xff] }
  0x1b   : > { %v283_v4 = vsel %vm278_vm0, %v275_v2, 0  ;;  %v337_v5 = vunpack.c.l.b16 %v275_v2  ;;  %v277_v18 = vpack.c.bf16 %v276_v17, %v276_v17 }
  0x1c   : > { %v332_v6 = vunpack.c.l.b16 %v273_v3  ;;  %292 = vmatpush.bf16.xpose.msra.mxu0 %v283_v4 }
  0x1d   : > { %v338_v8 = vpack.c.b16 %v337_v5, %v337_v5  ;;  %v314_v19 = vsel %vm312_vm1, %v277_v18, 0  ;;  %v373_v21 = vunpack.c.l.b16 %v277_v18 }
  0x1e   : > { %v333_v7 = vpack.c.b16 %v332_v6, %v332_v6  ;;  %323 = vmatpush.bf16.msra.mxu1 %v314_v19 }
  0x1f   : > { %458 = vrot.lane.b32.xlu2 %v338_v8, %s876_s12  ;;  %v374_v22 = vpack.c.b16 %v373_v21, %v373_v21 }
  0x20   : > { %334 = vrot.lane.b32.xlu1 %v333_v7, %s875_s11 }
  0x23   : > { %700 = vmatmul.msk.bf16.vlgmr.msra.gmra.mxu0 %vm278_vm0, %v273_v3 }
  0x27   : > { %398 = vrot.lane.b32.xlu2 %v333_v7, %s877_s13 }
  0x28   : > { %400 = vrot.lane.b32.xlu1 %v338_v8, %s877_s13 }
  0x30   : > { %456 = vrot.lane.b32.xlu1 %v333_v7, %s876_s12 }
  0x38   : > { %375 = vrot.lane.b32.xlu1 %v374_v22, %s875_s11 }
  0x79   : > { %v459_v10 = vpop.permute.xlu2 %458 }
  0x7a   : > { %v464_v11 = vsel %vm278_vm0, %v459_v10, 0 }
  0x7b   : > { %473 = vmatpush.bf16.xpose.msrb.mxu0 %v464_v11 }
  0x81   : > { %v399_v32 = vpop.permute.xlu2 %398 }
  0x92   : > { %v335_v9 = vpop.permute.xlu1 %334 }
  0x9a   : > { %v401_v12 = vpop.permute.xlu1 %400 }
  0x9b   : > { %v406_v20 = vsel %vm278_vm0, %v401_v12, 0 }
  0x9c   : > { %415 = vmatpush.bf16.xpose.msrb.mxu1 %v406_v20 }
  0xa0   : > { %v294_v13 = vpop.f32.mrf.mxu0 }
  0xa1   : > { %298 = vst.msk [vmem:[%s985_s22] sm:$0xff] %vm278_vm0, %v294_v13  ;;  %v299_v14 = vsel %vm278_vm0, %v294_v13, -inf }
  0xa2   : > { %300 = vmax.xlane.f32.xlu0 %v299_v14  ;;  %v457_v15 = vpop.permute.xlu1 %456 }
  0xa3   : > { %708 = vmatmul.msk.bf16.vlgmr.msrb.gmra.mxu0 %vm278_vm0, %v457_v15 }
  0xa8   : > { %v296_v16 = vpop.f32.mrf.mxu0 }
  0xaa   : > { %v376_v43 = vpop.permute.xlu1 %375 }
  0xab   : > { %v381_v44 = vsel %vm312_vm1, %v376_v43, 0 }
  0xac   : > { %390 = vmatpush.bf16.msra.mxu3 %v381_v44 }
  0xb6   : > { %339 = vrot.lane.b32.xlu0 %v338_v8, %s875_s11  ;;  %s559_s11 = sshll.u32 %s556_s10, 4  ;;  %s560_s11 = int_to_ptr.hbm [resolvable:$true] %s559_s11 }
 0x115   : > { %v301_v23 = vpop.xlane.xlu0 %300 }
 0x116   : > { %v302_v24 = vsub.f32 %v294_v13, %v301_v23 }
 0x118   : > { %v303_v25 = vmul.f32 1.442695, %v302_v24 }
 0x11a   : > { %779 = vpow2.f32 %v303_v25 }
 0x120   : > { %v780_v26 = vpop.eup %779  ;;  %v475_v28 = vpop.f32.mrf.mxu0 }
 0x121   : > { %v308_v27 = vpack.c.bf16 %v780_v26, %v780_v26  ;;  %709 = vst.msk [vmem:[%s985_s22 + $0x18] sm:$0xff] %vm278_vm0, %v475_v28  ;;  %v481_v33 = vsel %vm278_vm0, %v475_v28, -inf  ;;  %v305_v42 = vsel %vm278_vm0, %v780_v26, 0.0 }
 0x122   : > { %482 = vmax.xlane.f32.xlu1 %v481_v33 }
 0x123   : > { %701 = vmatmul.msk.bf16.vlgmr.msra.gmra.mxu1 %vm278_vm0, %v308_v27 }
 0x128   : > { %v340_v29 = vpop.permute.xlu0 %339  ;;  %v477_v31 = vpop.f32.mrf.mxu0 }
 0x129   : > { %v345_v30 = vsel %vm278_vm0, %v340_v29, 0 }
 0x12a   : > { %354 = vmatpush.bf16.xpose.msra.mxu2 %v345_v30 }
 0x131   : > { %702 = vmatmul.msk.bf16.vlgmr.msra.gmra.mxu2 %vm278_vm0, %v335_v9 }
 0x133   : > { %705 = vmatmul.msk.bf16.vlgmr.msrb.gmra.mxu1 %vm278_vm0, %v399_v32 }
 0x195   : > { %v483_v47 = vpop.xlane.xlu1 %482 }
 0x196   : > { %v484_v50 = vsub.f32 %v475_v28, %v483_v47 }
 0x198   : > { %v485_v53 = vmul.f32 1.442695, %v484_v50 }
 0x1a0   : > { %v1006_v34 = vpop.f32.mrf.mxu1 }
 0x1a8   : > { %v327_v35 = vpop.f32.mrf.mxu1 }
 0x1b0   : > { %v417_v36 = vpop.f32.mrf.mxu1 }
 0x1b1   : > { %706 = vst.msk [vmem:[%s985_s22 + $0x10] sm:$0xff] %vm278_vm0, %v417_v36  ;;  %v423_v37 = vsel %vm278_vm0, %v417_v36, -inf }
 0x1b2   : > { %424 = vmax.xlane.f32.xlu0 %v423_v37 }
 0x1b4   : > { %v356_v38 = vpop.f32.mrf.mxu2 }
 0x1b5   : > { %703 = vst.msk [vmem:[%s985_s22 + $0x8] sm:$0xff] %vm278_vm0, %v356_v38  ;;  %v362_v39 = vsel %vm278_vm0, %v356_v38, -inf }
 0x1b6   : > { %363 = vmax.xlane.f32.xlu2 %v362_v39 }
 0x1b8   : > { %v419_v40 = vpop.f32.mrf.mxu1 }
 0x1bc   : > { %v358_v41 = vpop.f32.mrf.mxu2 }
 0x1c6   : > { %491 = vrot.lane.b32.xlu0 %v374_v22, %s876_s12  ;;  %s541_s12 = scalar_lea.sflag [#allocation3], %s246_s14 }
 0x1ce   : > { %433 = vrot.lane.b32.xlu2 %v374_v22, %s877_s13  ;;  %s809_s13 = sshra.s32 %s560_s11, 4  ;;  %s810_s13 = int_to_ptr.hbm [resolvable:$true] %s809_s13 }
 0x1cf   : > { %s811_s21 = scalar_lea.hbm %s810_s13, 32  ;;  %p816_p1 = scmp.lt.s32.totalorder %s810_s13, %s1077_s4 }
 0x1d0   : > { %p812_p12 = scmp.ne.s32.totalorder %s810_s13, %s811_s21  ;;  %p817_p2 = scmp.lt.s32.totalorder %s815_s24, %s811_s21 }
 0x1d2   : > { %p813_p13 = pnand %p812_p12, %p947_p4  ;;  %p818_p3 = por %p817_p2, %p816_p1 }
 0x1d4   : > { %p814_p0 = pneg %p813_p13 }
 0x1d6   : > { %p819_p5 = pnand %p818_p3, %p814_p0 }
 0x1f0   : > { %306 = vadd.xlane.f32.xlu0 %v305_v42 }
 0x225   : > { %v425_v45 = vpop.xlane.xlu0 %424 }
 0x226   : > { %v426_v46 = vsub.f32 %v417_v36, %v425_v45 }
 0x228   : > { %v427_v48 = vmul.f32 1.442695, %v426_v46 }
 0x229   : > { %v364_v49 = vpop.xlane.xlu2 %363 }
 0x22a   : > { %781 = vpow2.f32 %v427_v48  ;;  %v365_v51 = vsub.f32 %v356_v38, %v364_v49 }
 0x22c   : > { %v366_v52 = vmul.f32 1.442695, %v365_v51 }
 0x22e   : > { %783 = vpow2.f32 %v366_v52 }
 0x22f   : > { %785 = vpow2.f32 %v485_v53 }
 0x230   : > { %v782_v54 = vpop.eup %781 }
 0x231   : > { %v429_v55 = vsel %vm278_vm0, %v782_v54, 0.0  ;;  %v434_v56 = vpop.permute.xlu2 %433  ;;  %v432_v2 = vpack.c.bf16 %v782_v54, %v782_v54 }
 0x232   : > { %430 = vadd.xlane.f32.xlu2 %v429_v55  ;;  %v439_v57 = vsel %vm312_vm1, %v434_v56, 0 }
 0x233   : > { %448 = vmatpush.bf16.msrb.mxu3 %v439_v57 }
 0x234   : > { %v784_v58 = vpop.eup %783 }
 0x235   : > { %v368_v59 = vsel %vm278_vm0, %v784_v58, 0.0  ;;  %v371_v60 = vpack.c.bf16 %v784_v58, %v784_v58  ;;  %v786_v61 = vpop.eup %785 }
 0x236   : > { %369 = vadd.xlane.f32.xlu1 %v368_v59  ;;  %v490_v0 = vpack.c.bf16 %v786_v61, %v786_v61  ;;  %v487_v1 = vsel %vm278_vm0, %v786_v61, 0.0 }
 0x237   : > { %704 = vmatmul.msk.bf16.vlgmr.msra.gmra.mxu3 %vm278_vm0, %v371_v60 }
 0x238   : > { %v492_v62 = vpop.permute.xlu0 %491 }
 0x239   : > { %v497_v63 = vsel %vm312_vm1, %v492_v62, 0 }
 0x23a   : > { %506 = vmatpush.bf16.msrb.mxu2 %v497_v63 }
 0x23d   : > { %710 = vmatmul.msk.bf16.vlgmr.msrb.gmra.mxu2 %vm278_vm0, %v490_v0 }
 0x23e   : > { %488 = vadd.xlane.f32.xlu1 %v487_v1 }
 0x247   : > { %707 = vmatmul.msk.bf16.vlgmr.msrb.gmra.mxu3 %vm278_vm0, %v432_v2 }
 0x2a5   : > { %v431_v10 = vpop.xlane.xlu2 %430 }
 0x2a9   : > { %v370_v3 = vpop.xlane.xlu1 %369 }
 0x2aa   : > { %787 = vrcp.f32 %v370_v3 }
 0x2b0   : > { %v788_v5 = vpop.eup %787 }
 0x2b1   : > { %v489_v4 = vpop.xlane.xlu1 %488 }
 0x2b2   : > { %789 = vrcp.f32 %v489_v4 }
 0x2b8   : > { %v790_v8 = vpop.eup %789 }
 0x2ba   : > { %v392_v6 = vpop.f32.mrf.mxu3 }
 0x2bb   : > { %v397_v7 = vmul.f32 %v788_v5, %v392_v6 }
 0x2bd   : > { %515 = vrot.lane.b32.xlu1 %v397_v7, %s878_s6 }
 0x2c0   : > { %v508_v9 = vpop.f32.mrf.mxu2 }
 0x2c1   : > { %v513_v11 = vmul.f32 %v790_v8, %v508_v9 }
 0x2c2   : > { %v394_v12 = vpop.f32.mrf.mxu3 }
 0x2c3   : > { %822 = shalt.err (!%p819_p5)
}
 0x2c4   : > { %s879_s14 = smov 128   ;;  %s880_s7 = smov 24   ;;  %791 = vrcp.f32 %v431_v10  ;;  %v307_v18 = vpop.xlane.xlu0 %306  ;;  %vm527_vm2 = vcmask 130048   ;;  %vm529_vm3 = vcmask 195584   ;;  %vm531_vm4 = vcmask 261120  }
 0x2c5   : > { %717 = dma.vmem_to_hbm [thread:$0]  (%p947_p4), %s558_s5, 512, %s560_s11, %s541_s12, %s879_s14, %s879_s14, %s878_s6   ;;  %793 = vrcp.f32 %v307_v18 }
 0x2c6   : > { %523 = vrot.lane.b32.xlu2 %v513_v11, %s880_s7  ;;  %s881_s8 = smov 16   ;;  %s270_s6 = scalar_lea.vmem %s1076_s3, %s964_s30 }
 0x2c8   : > { %v510_v13 = vpop.f32.mrf.mxu2 }
 0x2ca   : > { %v792_v14 = vpop.eup %791  ;;  %v450_v15 = vpop.f32.mrf.mxu3 }
 0x2cb   : > { %v455_v16 = vmul.f32 %v792_v14, %v450_v15  ;;  %v794_v20 = vpop.eup %793 }
 0x2cc   : > { %v330_v21 = vmul.f32 %v794_v20, %v1006_v34 }
 0x2cd   : > { %519 = vrot.lane.b32.xlu1 %v455_v16, %s881_s8 }
 0x2d2   : > { %v452_v17 = vpop.f32.mrf.mxu3 }
 0x320   : > { %v524_v24 = vpop.permute.xlu2 %523 }
 0x32f   : > { %v516_v19 = vpop.permute.xlu1 %515 }
 0x330   : > { %v526_v22 = vsel %vm278_vm0, %v330_v21, %v516_v19 }
 0x33f   : > { %v520_v23 = vpop.permute.xlu1 %519 }
 0x340   : > { %v528_v25 = vsel %vm527_vm2, %v526_v22, %v520_v23 }
 0x341   : > { %v530_v26 = vsel %vm529_vm3, %v528_v25, %v524_v24 }
 0x342   : > { %532 = vst.msk [vmem:[%s270_s6] sm:$0xff] %vm531_vm4, %v530_v26 }
 0x343 PF: > { %p723_p4 = scmp.ge.s32.totalorder %s873_s20, 2  ;;  %s584_s9 = sand.u32 1, %s853_s15  }
 0x344   : > { %s585_s10 = scalar_lea.sflag [#allocation3], %s584_s9 }
 0x345   : > { %p720_p6 = pnand %p723_p4, %p954_p8 }
 0x347   : > { %p721_p7 = pneg %p720_p6 }
 0x349   : > { %848 = dma.done.wait (%p721_p7), %s585_s10, 512  }
 0x34a   : > { %850 = vsyncadd (%p721_p7), %s585_s10, 4294966784  ;;  %s18_s20 = sadd.s32 1, %s873_s20   ;;  %s1080_s15 = smov %s857_s16 }
 0x34b   : > { %p15_p9 = scmp.ge.s32.totalorder %s18_s20, 4   ;;  %s1081_s16 = smov %s861_s17 }
 0x34c   : > { %s1082_s17 = smov %s960_s28  ;;  %s1083_s18 = smov %s869_s19 }
 0x34d   : > { %s1084_s19 = smov %s1086_s23  ;;  %17 = sbr.rel (!%p15_p9) target bundleno = 4 (0x4), region = 88 }
 0x352   :  { %591 = vsyncpa [#allocation3], 1 }
 0x353   :  { %593 = vsyncpa [#allocation3 + $0x1], 1 }

</bundles_post_ra>
